<compile_context>
chip_gen: v7x
topology: tpu7x:2x2x1
jax: 0.10.0
libtpu: 0.0.40
codegen_flags: <defaults>
</compile_context>

<pallas_src>
import functools

import jax
import jax.numpy as jnp
from jax.experimental import pallas as pl
from jax.experimental.pallas import tpu as pltpu


def _convs_kernel(x_ref, w1_ref, b1_ref, w2_ref, b2_ref, out_ref,
                  *, N, H1, H2, H3, K1, K2):
    """Fused conv1 -> ReLU -> conv2, one invocation for the whole batch.

    x_ref:   (N*H1, W1*C_IN)         packed NHWC rows (W and C share lanes)
    w1_ref:  (K1*W1*C_IN, W2*C_MID)  banded/Toeplitz conv1 weights
    b1_ref:  (1, W2*C_MID)           bias tiled across the packed lane axis
    w2_ref:  (K2*W2*C_MID, W3*C_OUT) banded/Toeplitz conv2 weights
    b2_ref:  (1, W3*C_OUT)
    out_ref: (N*H3, W3*C_OUT)        packed output slab
    """
    # conv1: batch-stacked im2col over the kh taps -> ONE MXU matmul,
    # contracting K1*W1*C_IN (=192) over N*H2 (=28) rows.
    t1 = jnp.concatenate(
        [jnp.concatenate(
            [x_ref[n * H1 + kh: n * H1 + kh + H2, :] for kh in range(K1)],
            axis=-1)
         for n in range(N)],
        axis=0)                                          # (N*H2, K1*W1*C_IN)
    mid = jnp.dot(t1, w1_ref[...], preferred_element_type=jnp.float32)
    # bias + ReLU on the VPU, on a lane-dense (N*H2, W2*C_MID) value.
    mid = jnp.maximum(mid + b1_ref[...], 0.0)

    # conv2: same trick; the intermediate never round-trips through VMEM.
    t2 = jnp.concatenate(
        [jnp.concatenate(
            [mid[n * H2 + kh: n * H2 + kh + H3, :] for kh in range(K2)],
            axis=-1)
         for n in range(N)],
        axis=0)                                          # (N*H3, K2*W2*C_MID)
    y = jnp.dot(t2, w2_ref[...], preferred_element_type=jnp.float32)
    out_ref[...] = (y + b2_ref[...]).astype(out_ref.dtype)


def _toeplitz_weight(w_oihw, w_in, w_out):
    """Fold the kw taps of a VALID 2D conv into a banded matmul weight.

    Returns W of shape (K * w_in * Cin, w_out * Cout) such that, with rows of
    the packed input laid out as (win, c) and output lanes as (wout, co):
      W[kh*w_in*Cin + win*Cin + c, wout*Cout + co] =
          w_oihw[co, c, kh, win - wout]   if 0 <= win - wout < K else 0.
    """
    cout, cin, k_h, k_w = w_oihw.shape
    w_hwio = jnp.transpose(w_oihw, (2, 3, 1, 0)).astype(jnp.float32)
    bands = []
    for kh in range(k_h):
        m = jnp.zeros((w_in * cin, w_out * cout), jnp.float32)
        for kw in range(k_w):
            shift = jnp.eye(w_in, w_out, k=-kw, dtype=jnp.float32)
            m = m + jnp.kron(shift, w_hwio[kh, kw])
        bands.append(m)
    return jnp.concatenate(bands, axis=0)


def back_to_back_convs(x_nchw, w1_oihw, b1, w2_oihw, b2):
    """Forward pass of BackToBackConvs. Inputs follow PyTorch conventions."""
    N, C_IN, H1, W1 = x_nchw.shape
    C_MID, _, K1, _ = w1_oihw.shape
    C_OUT, _, K2, _ = w2_oihw.shape
    H2, W2 = H1 - (K1 - 1), W1 - (K1 - 1)
    H3, W3 = H2 - (K2 - 1), W2 - (K2 - 1)
    f32 = jnp.float32

    # ---- layout glue (plain JAX): NCHW -> (N*H, W*C) lane-packed input,
    #      OIHW -> banded/Toeplitz matmul weights, tiled biases.
    x_packed = jnp.transpose(x_nchw, (0, 2, 3, 1)).reshape(
        N * H1, W1 * C_IN).astype(f32)
    w1_big = _toeplitz_weight(w1_oihw, W1, W2)          # (K1*W1*C_IN, W2*C_MID)
    w2_big = _toeplitz_weight(w2_oihw, W2, W3)          # (K2*W2*C_MID, W3*C_OUT)
    b1_row = jnp.tile(b1.astype(f32), W2).reshape(1, W2 * C_MID)
    b2_row = jnp.tile(b2.astype(f32), W3).reshape(1, W3 * C_OUT)

    kernel = functools.partial(
        _convs_kernel, N=N, H1=H1, H2=H2, H3=H3, K1=K1, K2=K2)

    out_packed = pl.pallas_call(
        kernel,
        out_shape=jax.ShapeDtypeStruct((N * H3, W3 * C_OUT), f32),
        in_specs=[pl.BlockSpec(memory_space=pltpu.MemorySpace.VMEM)] * 5,
        out_specs=pl.BlockSpec(memory_space=pltpu.MemorySpace.VMEM),
    )(x_packed, w1_big, b1_row, w2_big, b2_row)

    # Unpack (N*H3, W3*C_OUT) -> NCHW (plain JAX glue).
    return jnp.transpose(
        out_packed.reshape(N, H3, W3, C_OUT), (0, 3, 1, 2))


def _reference(x_nchw, w1_oihw, b1, w2_oihw, b2):
    dn = ("NCHW", "OIHW", "NCHW")
    y = jax.lax.conv_general_dilated(x_nchw, w1_oihw, (1, 1), "VALID",
                                     dimension_numbers=dn)
    y = jnp.maximum(y + b1[None, :, None, None], 0.0)
    y = jax.lax.conv_general_dilated(y, w2_oihw, (1, 1), "VALID",
                                     dimension_numbers=dn)
    return y + b2[None, :, None, None]


if __name__ == "__main__":
    # Deterministic synthetic parameters (Conv2d(4,8,3), Conv2d(8,4,3)).
    key = jax.random.PRNGKey(0)
    kx, kw1, kb1, kw2, kb2 = jax.random.split(key, 5)

    N, C_IN, H, W = 2, 4, 16, 16
    C_MID, C_OUT, K = 8, 4, 3

    x = jax.random.normal(kx, (N, C_IN, H, W), jnp.float32)
    w1 = jax.random.normal(kw1, (C_MID, C_IN, K, K), jnp.float32) * 0.1
    b1 = jax.random.normal(kb1, (C_MID,), jnp.float32) * 0.1
    w2 = jax.random.normal(kw2, (C_OUT, C_MID, K, K), jnp.float32) * 0.1
    b2 = jax.random.normal(kb2, (C_OUT,), jnp.float32) * 0.1

    out = back_to_back_convs(x, w1, b1, w2, b2)
    out = jax.block_until_ready(out)

    ref = _reference(x, w1, b1, w2, b2)
    assert out.shape == (N, C_OUT, H - 2 * (K - 1), W - 2 * (K - 1)), out.shape
    assert jnp.allclose(out, ref, rtol=1e-4, atol=1e-4), (
        float(jnp.max(jnp.abs(out - ref))))

    print("KERNEL_OK")
</pallas_src>

<mosaic_0001>
module attributes {stable_mosaic.version = 11 : i64} {
  func.func @_convs_kernel(%arg0: memref<32x64xf32, #tpu.memory_space<vmem>>, %arg1: memref<192x112xf32, #tpu.memory_space<vmem>>, %arg2: memref<1x112xf32, #tpu.memory_space<vmem>>, %arg3: memref<336x48xf32, #tpu.memory_space<vmem>>, %arg4: memref<1x48xf32, #tpu.memory_space<vmem>>, %arg5: memref<24x48xf32, #tpu.memory_space<vmem>>) attributes {dimension_semantics = [], scalar_prefetch = 0 : i64, scratch_operands = 0 : i64, tpu.core_type = #tpu.core_type<tc>} {
    %c0 = arith.constant 0 : index
    %c0_0 = arith.constant 0 : index
    %0 = vector.load %arg0[%c0, %c0_0] : memref<32x64xf32, #tpu.memory_space<vmem>>, vector<14x64xf32>
    %c1 = arith.constant 1 : index
    %c0_1 = arith.constant 0 : index
    %1 = vector.load %arg0[%c1, %c0_1] : memref<32x64xf32, #tpu.memory_space<vmem>>, vector<14x64xf32>
    %c2 = arith.constant 2 : index
    %c0_2 = arith.constant 0 : index
    %2 = vector.load %arg0[%c2, %c0_2] : memref<32x64xf32, #tpu.memory_space<vmem>>, vector<14x64xf32>
    %3 = tpu.concatenate %0, %1, %2 in 1 : vector<14x64xf32>, vector<14x64xf32>, vector<14x64xf32> -> vector<14x192xf32>
    %c16 = arith.constant 16 : index
    %c0_3 = arith.constant 0 : index
    %4 = vector.load %arg0[%c16, %c0_3] : memref<32x64xf32, #tpu.memory_space<vmem>>, vector<14x64xf32>
    %c17 = arith.constant 17 : index
    %c0_4 = arith.constant 0 : index
    %5 = vector.load %arg0[%c17, %c0_4] : memref<32x64xf32, #tpu.memory_space<vmem>>, vector<14x64xf32>
    %c18 = arith.constant 18 : index
    %c0_5 = arith.constant 0 : index
    %6 = vector.load %arg0[%c18, %c0_5] : memref<32x64xf32, #tpu.memory_space<vmem>>, vector<14x64xf32>
    %7 = tpu.concatenate %4, %5, %6 in 1 : vector<14x64xf32>, vector<14x64xf32>, vector<14x64xf32> -> vector<14x192xf32>
    %8 = tpu.concatenate %3, %7 in 0 : vector<14x192xf32>, vector<14x192xf32> -> vector<28x192xf32>
    %c0_6 = arith.constant 0 : index
    %c0_7 = arith.constant 0 : index
    %9 = vector.load %arg1[%c0_6, %c0_7] : memref<192x112xf32, #tpu.memory_space<vmem>>, vector<192x112xf32>
    %cst = arith.constant dense<0.000000e+00> : vector<28x112xf32>
    %10 = tpu.matmul %8, %9, %cst {dimension_numbers = #tpu.dot_dimension_numbers<[1], [0], [0], [1], [0, 0, 1, 1], [], []>} : vector<28x192xf32>, vector<192x112xf32>, vector<28x112xf32> -> vector<28x112xf32>
    %c0_8 = arith.constant 0 : index
    %c0_9 = arith.constant 0 : index
    %11 = vector.load %arg2[%c0_8, %c0_9] : memref<1x112xf32, #tpu.memory_space<vmem>>, vector<1x112xf32>
    %12 = vector.broadcast %11 : vector<1x112xf32> to vector<28x112xf32>
    %13 = arith.addf %10, %12 : vector<28x112xf32>
    %cst_10 = arith.constant 0.000000e+00 : f32
    %14 = vector.broadcast %cst_10 : f32 to vector<28x112xf32>
    %15 = arith.maximumf %13, %14 : vector<28x112xf32>
    %16 = vector.extract_strided_slice %15 {offsets = [0, 0], sizes = [12, 112], strides = [1, 1]} : vector<28x112xf32> to vector<12x112xf32>
    %17 = vector.extract_strided_slice %15 {offsets = [1, 0], sizes = [12, 112], strides = [1, 1]} : vector<28x112xf32> to vector<12x112xf32>
    %18 = vector.extract_strided_slice %15 {offsets = [2, 0], sizes = [12, 112], strides = [1, 1]} : vector<28x112xf32> to vector<12x112xf32>
    %19 = tpu.concatenate %16, %17, %18 in 1 : vector<12x112xf32>, vector<12x112xf32>, vector<12x112xf32> -> vector<12x336xf32>
    %20 = vector.extract_strided_slice %15 {offsets = [14, 0], sizes = [12, 112], strides = [1, 1]} : vector<28x112xf32> to vector<12x112xf32>
    %21 = vector.extract_strided_slice %15 {offsets = [15, 0], sizes = [12, 112], strides = [1, 1]} : vector<28x112xf32> to vector<12x112xf32>
    %22 = vector.extract_strided_slice %15 {offsets = [16, 0], sizes = [12, 112], strides = [1, 1]} : vector<28x112xf32> to vector<12x112xf32>
    %23 = tpu.concatenate %20, %21, %22 in 1 : vector<12x112xf32>, vector<12x112xf32>, vector<12x112xf32> -> vector<12x336xf32>
    %24 = tpu.concatenate %19, %23 in 0 : vector<12x336xf32>, vector<12x336xf32> -> vector<24x336xf32>
    %c0_11 = arith.constant 0 : index
    %c0_12 = arith.constant 0 : index
    %25 = vector.load %arg3[%c0_11, %c0_12] : memref<336x48xf32, #tpu.memory_space<vmem>>, vector<336x48xf32>
    %cst_13 = arith.constant dense<0.000000e+00> : vector<24x48xf32>
    %26 = tpu.matmul %24, %25, %cst_13 {dimension_numbers = #tpu.dot_dimension_numbers<[1], [0], [0], [1], [0, 0, 1, 1], [], []>} : vector<24x336xf32>, vector<336x48xf32>, vector<24x48xf32> -> vector<24x48xf32>
    %c0_14 = arith.constant 0 : index
    %c0_15 = arith.constant 0 : index
    %27 = vector.load %arg4[%c0_14, %c0_15] : memref<1x48xf32, #tpu.memory_space<vmem>>, vector<1x48xf32>
    %28 = vector.broadcast %27 : vector<1x48xf32> to vector<24x48xf32>
    %29 = arith.addf %26, %28 : vector<24x48xf32>
    %c0_16 = arith.constant 0 : index
    %c0_17 = arith.constant 0 : index
    %30 = vector.load %arg5[%c0_16, %c0_17] : memref<24x48xf32, #tpu.memory_space<vmem>>, vector<24x48xf32>
    tpu.vector_store %arg5[%c0_16, %c0_17], %29 {strides = array<i32>} : memref<24x48xf32, #tpu.memory_space<vmem>>, vector<24x48xf32>,
    return
  }
}

</mosaic_0001>

<bundles_post_ra>
// kernel: tpu_custom_call.1
= control target key start
LH: loop header
LB: loop body
LE: loop exit
PB: predicated region body
PF: predicated region fallthrough
CT: control target
= control target key end

     0   :  { %s751_s24 = smov 64   ;;  %v752_v4 = vmov 0.0|0.0   ;;  %vm35_vm0 = vcmask 523264   ;;  %s1114_s0 = inlined_call_operand.vmem [shape: f32[32,64], index: 0, kind: input, shape index: {}]   ;;  %s1115_s1 = inlined_call_operand.vmem [shape: f32[192,112], index: 1, kind: input, shape index: {}]   ;;  %s1116_s2 = inlined_call_operand.vmem [shape: f32[1,112], index: 2, kind: input, shape index: {}]   ;;  %s1117_s3 = inlined_call_operand.vmem [shape: f32[336,48], index: 3, kind: input, shape index: {}]   ;;  %s1118_s4 = inlined_call_operand.vmem [shape: f32[1,48], index: 4, kind: input, shape index: {}]   ;;  %s1119_s5 = inlined_call_operand.hbm [shape: f32[24,48], index: 5, kind: output, shape index: {}]  }
   0x1   :  { %v23_v0 = vld [vmem:[%s1114_s0 + $0x1] sm:$0xff]  ;;  %v40_v1 = vld [vmem:[%s1114_s0 + $0x11] sm:$0xff]  ;;  %v41_v2 = vld [vmem:[%s1114_s0 + $0x19] sm:$0x3f]  ;;  %620 = vmatprep.subr.bf16.mxu0 %v752_v4 }
   0x2   :  { %v712_v3 = vpack.i.bf16 %v40_v1, %v23_v0  ;;  %48 = vrot.lane.b32.xlu1 %v41_v2, %s751_s24  ;;  %v71_v5 = vld [vmem:[%s1115_s1] sm:$0xff]  ;;  %v72_v6 = vld [vmem:[%s1115_s1 + $0x8] sm:$0xff]  ;;  %v73_v8 = vld [vmem:[%s1115_s1 + $0x10] sm:$0xff] }
   0x3   :  { %v621_v7 = vpack.c.bf16 %v72_v6, %v71_v5  ;;  %v74_v9 = vld [vmem:[%s1115_s1 + $0x18] sm:$0xff]  ;;  %v24_v10 = vld [vmem:[%s1114_s0 + $0x9] sm:$0x3f]  ;;  %v75_v12 = vld [vmem:[%s1115_s1 + $0x20] sm:$0xff] }
   0x4   :  { %713 = vrot.lane.b32.xlu0 %v712_v3, %s751_s24  ;;  %v624_v11 = vpack.c.bf16 %v74_v9, %v73_v8  ;;  %v76_v13 = vld [vmem:[%s1115_s1 + $0x28] sm:$0xff]  ;;  %v77_v15 = vld [vmem:[%s1115_s1 + $0x30] sm:$0xff]  ;;  %v78_v16 = vld [vmem:[%s1115_s1 + $0x38] sm:$0xff] }
   0x5   :  { %622 = vmatpush1.bf16.msra.mxu0 %v621_v7  ;;  %v627_v14 = vpack.c.bf16 %v76_v13, %v75_v12  ;;  %v25_v17 = vld [vmem:[%s1114_s0 + $0x2] sm:$0xff]  ;;  %v630_v18 = vpack.c.bf16 %v78_v16, %v77_v15 }
   0x6   :  { %623 = vmatprep.subr.bf16.mxu0 %v752_v4  ;;  %529 = vmatprep.mubr.msk.f32.mxu0 %vm35_vm0, %v25_v17 }
   0x8   :  { %31 = vrot.lane.b32.xlu0 %v24_v10, %s751_s24 }
   0x9   :  { %625 = vmatpush1.bf16.msra.mxu0 %v624_v11 }
   0xa   :  { %626 = vmatprep.subr.bf16.mxu0 %v752_v4 }
   0xd   :  { %628 = vmatpush1.bf16.msra.mxu0 %v627_v14 }
   0xe   :  { %10 = vsyncpa [#allocation3], 0  ;;  %629 = vmatprep.subr.bf16.mxu0 %v752_v4  ;;  %v79_v19 = vld [vmem:[%s1115_s1 + $0x40] sm:$0xff]  ;;  %v80_v20 = vld [vmem:[%s1115_s1 + $0x48] sm:$0xff]  ;;  %vm58_vm1 = vcmask 1045504   ;;  %s753_s25 = smov 96  }
   0xf   :  { %v633_v21 = vpack.c.bf16 %v80_v20, %v79_v19  ;;  %v81_v22 = vld [vmem:[%s1115_s1 + $0x50] sm:$0xff]  ;;  %v82_v23 = vld [vmem:[%s1115_s1 + $0x58] sm:$0xff]  ;;  %v83_v25 = vld [vmem:[%s1115_s1 + $0x60] sm:$0xff]  ;;  %vm203_vm2 = vcmask 1046528   ;;  %s754_s26 = smov 112   ;;  %vm222_vm3 = vcmask 916480  }
  0x10   :  { %v636_v24 = vpack.c.bf16 %v82_v23, %v81_v22  ;;  %v84_v26 = vld [vmem:[%s1115_s1 + $0x68] sm:$0xff]  ;;  %v85_v28 = vld [vmem:[%s1115_s1 + $0x70] sm:$0xff]  ;;  %v86_v29 = vld [vmem:[%s1115_s1 + $0x78] sm:$0xff]  ;;  %vm225_vm4 = vcmask 785408   ;;  %vm287_vm5 = vcmask 1043456   ;;  %vm755_vm6 = vmmov 0  }
  0x11   :  { %631 = vmatpush1.bf16.msra.mxu0 %v630_v18  ;;  %v639_v27 = vpack.c.bf16 %v84_v26, %v83_v25  ;;  %v642_v30 = vpack.c.bf16 %v86_v29, %v85_v28  ;;  %v87_v31 = vld [vmem:[%s1115_s1 + $0x80] sm:$0xff]  ;;  %v88_v32 = vld [vmem:[%s1115_s1 + $0x88] sm:$0xff]  ;;  %v89_v34 = vld [vmem:[%s1115_s1 + $0x90] sm:$0xff]  ;;  %vm340_vm7 = vcmask 654336   ;;  %vm508_vm8 = vcmask 392192   ;;  %s757_s20 = smov [#allocation2]  }
  0x12   :  { %632 = vmatprep.subr.bf16.mxu0 %v752_v4  ;;  %v645_v33 = vpack.c.bf16 %v88_v32, %v87_v31  ;;  %v90_v35 = vld [vmem:[%s1115_s1 + $0x98] sm:$0xff]  ;;  %v91_v37 = vld [vmem:[%s1115_s1 + $0xa0] sm:$0xff]  ;;  %v92_v38 = vld [vmem:[%s1115_s1 + $0xa8] sm:$0xff]  ;;  %s517_s21 = sshll.u32 %s757_s20, 4  ;;  %s518_s21 = int_to_ptr.vmem [resolvable:$true] %s517_s21 }
  0x13   :  { %v648_v36 = vpack.c.bf16 %v90_v35, %v89_v34  ;;  %v651_v39 = vpack.c.bf16 %v92_v38, %v91_v37  ;;  %v93_v40 = vld [vmem:[%s1115_s1 + $0xb0] sm:$0xff]  ;;  %v94_v41 = vld [vmem:[%s1115_s1 + $0xb8] sm:$0xff]  ;;  %v26_v45 = vld [vmem:[%s1114_s0 + $0xa] sm:$0x3f]  ;;  %p732_p1 = scmp.lt.s32.totalorder %s518_s21, %s518_s21 }
  0x14   :  { %v654_v42 = vpack.c.bf16 %v94_v41, %v93_v40  ;;  %v42_v43 = vld [vmem:[%s1114_s0 + $0x12] sm:$0xff]  ;;  %v43_v46 = vld [vmem:[%s1114_s0 + $0x1a] sm:$0x3f]  ;;  %v21_v49 = vld [vmem:[%s1114_s0] sm:$0xff] }
  0x15   :  { %634 = vmatpush1.bf16.msra.mxu0 %v633_v21  ;;  %v60_v44 = vrot.slane %v42_v43, 2  ;;  %v38_v47 = vld [vmem:[%s1114_s0 + $0x10] sm:$0xff]  ;;  %v39_v52 = vld [vmem:[%s1114_s0 + $0x18] sm:$0x3f]  ;;  %v22_v54 = vld [vmem:[%s1114_s0 + $0x8] sm:$0x3f] }
  0x16   :  { %635 = vmatprep.subr.bf16.mxu0 %v752_v4  ;;  %v63_v56 = vrot.slane %v43_v46, 2  ;;  %v307_v3 = vld [vmem:[%s1117_s3 + $0x80] sm:$0xff]  ;;  %v308_v5 = vld [vmem:[%s1117_s3 + $0x88] sm:$0xff]  ;;  %v309_v9 = vld [vmem:[%s1117_s3 + $0x90] sm:$0xff] }
  0x17   :  { %v70_v55 = vsel %vm58_vm1, %v26_v45, %v60_v44  ;;  %v291_v6 = vld [vmem:[%s1117_s3] sm:$0xff]  ;;  %v656_v7 = vpack.c.bf16 %v308_v5, %v307_v3  ;;  %v292_v8 = vld [vmem:[%s1117_s3 + $0x8] sm:$0xff]  ;;  %v310_v10 = vld [vmem:[%s1117_s3 + $0x98] sm:$0xff] }
  0x18   :  { %v64_v0 = vsel %vm58_vm1, %v60_v44, %v63_v56  ;;  %v658_v11 = vpack.c.bf16 %v292_v8, %v291_v6  ;;  %v660_v12 = vpack.c.bf16 %v310_v10, %v309_v9  ;;  %v293_v13 = vld [vmem:[%s1117_s3 + $0x10] sm:$0xff]  ;;  %v294_v14 = vld [vmem:[%s1117_s3 + $0x18] sm:$0xff]  ;;  %v311_v15 = vld [vmem:[%s1117_s3 + $0xa0] sm:$0xff] }
  0x19   :  { %637 = vmatpush1.bf16.msra.mxu0 %v636_v24  ;;  %657 = vmatprep.subr.bf16.mxu1 %v656_v7  ;;  %v312_v16 = vld [vmem:[%s1117_s3 + $0xa8] sm:$0xff]  ;;  %v662_v17 = vpack.c.bf16 %v294_v14, %v293_v13  ;;  %v295_v19 = vld [vmem:[%s1117_s3 + $0x20] sm:$0xff]  ;;  %v313_v21 = vld [vmem:[%s1117_s3 + $0xb0] sm:$0xff] }
  0x1a   :  { %638 = vmatprep.subr.bf16.mxu0 %v752_v4  ;;  %659 = vmatpush3.bf16.msra.mxu1 %v658_v11  ;;  %v664_v18 = vpack.c.bf16 %v312_v16, %v311_v15  ;;  %v296_v20 = vld [vmem:[%s1117_s3 + $0x28] sm:$0xff]  ;;  %v314_v22 = vld [vmem:[%s1117_s3 + $0xb8] sm:$0xff]  ;;  %v297_v25 = vld [vmem:[%s1117_s3 + $0x30] sm:$0xff] }
  0x1b   :  { %661 = vmatprep.subr.bf16.mxu1 %v660_v12  ;;  %v666_v23 = vpack.c.bf16 %v296_v20, %v295_v19  ;;  %v668_v24 = vpack.c.bf16 %v314_v22, %v313_v21  ;;  %v298_v26 = vld [vmem:[%s1117_s3 + $0x38] sm:$0xff]  ;;  %v316_v28 = vld [vmem:[%s1117_s3 + $0xc8] sm:$0xff]  ;;  %v299_v31 = vld [vmem:[%s1117_s3 + $0x40] sm:$0xff] }
  0x1c   :  { %v670_v29 = vpack.c.bf16 %v298_v26, %v297_v25  ;;  %v300_v32 = vld [vmem:[%s1117_s3 + $0x48] sm:$0xff]  ;;  %v318_v34 = vld [vmem:[%s1117_s3 + $0xd8] sm:$0xff]  ;;  %v301_v37 = vld [vmem:[%s1117_s3 + $0x50] sm:$0xff] }
  0x1d   :  { %640 = vmatpush1.bf16.msra.mxu0 %v639_v27  ;;  %v315_v27 = vld [vmem:[%s1117_s3 + $0xc0] sm:$0xff]  ;;  %v674_v35 = vpack.c.bf16 %v300_v32, %v299_v31  ;;  %v302_v38 = vld [vmem:[%s1117_s3 + $0x58] sm:$0xff]  ;;  %v320_v41 = vld [vmem:[%s1117_s3 + $0xe8] sm:$0xff] }
  0x1e   :  { %641 = vmatprep.subr.bf16.mxu0 %v752_v4  ;;  %663 = vmatpush3.bf16.msra.mxu1 %v662_v17  ;;  %v319_v40 = vld [vmem:[%s1117_s3 + $0xe0] sm:$0xff]  ;;  %v304_v45 = vld [vmem:[%s1117_s3 + $0x68] sm:$0xff]  ;;  %v325_v31 = vld [vmem:[%s1117_s3 + $0x110] sm:$0xff] }
  0x1f   :  { %665 = vmatprep.subr.bf16.mxu1 %v664_v18  ;;  %v680_v43 = vpack.c.bf16 %v320_v41, %v319_v40  ;;  %v303_v44 = vld [vmem:[%s1117_s3 + $0x60] sm:$0xff]  ;;  %v326_v32 = vld [vmem:[%s1117_s3 + $0x118] sm:$0xff]  ;;  %v328_v40 = vld [vmem:[%s1117_s3 + $0x128] sm:$0xff] }
  0x20   :  { %v682_v46 = vpack.c.bf16 %v304_v45, %v303_v44  ;;  %v323_v22 = vld [vmem:[%s1117_s3 + $0x100] sm:$0xff] }
  0x21   :  { %643 = vmatpush1.bf16.msra.mxu0 %v642_v30  ;;  %v672_v30 = vpack.c.bf16 %v316_v28, %v315_v27 }
  0x22   :  { %644 = vmatprep.subr.bf16.mxu0 %v752_v4  ;;  %667 = vmatpush3.bf16.msra.mxu1 %v666_v23  ;;  %v324_v23 = vld [vmem:[%s1117_s3 + $0x108] sm:$0xff] }
  0x23   :  { %669 = vmatprep.subr.bf16.mxu1 %v668_v24  ;;  %v689_v28 = vpack.c.bf16 %v324_v23, %v323_v22  ;;  %v533_v22 = vld [vmem:[%s1118_s4] ss:$0 sm:$0xff]  ;;  %s727_s4 = scalar_lea.vmem %s518_s21, 384 }
  0x24   :  { %p728_p0 = scmp.ne.s32.totalorder %s518_s21, %s727_s4  ;;  %p733_p2 = scmp.lt.s32.totalorder %s727_s4, %s727_s4 }
  0x25   :  { %646 = vmatpush1.bf16.msra.mxu0 %v645_v33  ;;  %v317_v33 = vld [vmem:[%s1117_s3 + $0xd0] sm:$0xff] }
  0x26   :  { %647 = vmatprep.subr.bf16.mxu0 %v752_v4  ;;  %671 = vmatpush3.bf16.msra.mxu1 %v670_v29  ;;  %p734_p3 = por %p733_p2, %p732_p1 }
  0x27   :  { %673 = vmatprep.subr.bf16.mxu1 %v672_v30 }
  0x28   :  { %p735_p4 = pnand %p734_p3, %p728_p0 }
  0x29   :  { %649 = vmatpush1.bf16.msra.mxu0 %v648_v36  ;;  %v676_v36 = vpack.c.bf16 %v318_v34, %v317_v33 }
  0x2a   :  { %650 = vmatprep.subr.bf16.mxu0 %v752_v4  ;;  %675 = vmatpush3.bf16.msra.mxu1 %v674_v35 }
  0x2b   :  { %677 = vmatprep.subr.bf16.mxu1 %v676_v36 }
  0x2d   :  { %652 = vmatpush1.bf16.msra.mxu0 %v651_v39  ;;  %v678_v39 = vpack.c.bf16 %v302_v38, %v301_v37  ;;  %v692_v37 = vpack.c.bf16 %v326_v32, %v325_v31 }
  0x2e   :  { %653 = vmatprep.subr.bf16.mxu0 %v752_v4 }
  0x2f   :  { %679 = vmatpush3.bf16.msra.mxu1 %v678_v39  ;;  %v327_v39 = vld [vmem:[%s1117_s3 + $0x120] sm:$0xff] }
  0x30   :  { %681 = vmatprep.subr.bf16.mxu1 %v680_v43 }
  0x31   :  { %655 = vmatpush1.bf16.msra.mxu0 %v654_v42  ;;  %v528_v42 = vld [vmem:[%s1116_s2] ss:$0 sm:$0xff] }
  0x33   :  { %683 = vmatpush3.bf16.msra.mxu1 %v682_v46 }
  0x74   :  { %v49_v53 = vpop.permute.xlu1 %48 }
  0x75   :  { %v53_v59 = vsel %vm35_vm0, %v39_v52, %v49_v53  ;;  %v305_v53 = vld [vmem:[%s1117_s3 + $0x70] sm:$0xff] }
  0x76   :  { %v714_v48 = vpop.permute.xlu0 %713  ;;  %v61_v1 = vrot.slane %v53_v59, 2 }
  0x77   :  { %v716_v50 = vunpack.i.h.bf16 %v714_v48  ;;  %v715_v51 = vunpack.i.l.bf16 %v714_v48 }
  0x79   :  { %v52_v57 = vsel %vm35_vm0, %v38_v47, %v716_v50  ;;  %v36_v58 = vsel %vm35_vm0, %v21_v49, %v715_v51  ;;  %v321_v50 = vld [vmem:[%s1117_s3 + $0xf0] sm:$0xff]  ;;  %v322_v51 = vld [vmem:[%s1117_s3 + $0xf8] sm:$0xff] }
  0x7a   :  { %v32_v60 = vpop.permute.xlu0 %31  ;;  %177 = vmatmul.mubr.f32.vlgmr.msra.gmra.mrb[0].mxu0 %v36_v58  ;;  %v59_v61 = vrot.slane %v52_v57, 2  ;;  %v684_v52 = vpack.c.bf16 %v322_v51, %v321_v50  ;;  %v329_v51 = vld [vmem:[%s1117_s3 + $0x130] sm:$0xff] }
  0x7b   :  { %v37_v62 = vsel %vm35_vm0, %v22_v54, %v32_v60  ;;  %530 = vmatprep.mubr.msk.f32.mxu0 %vm35_vm0, %v70_v55  ;;  %v306_v54 = vld [vmem:[%s1117_s3 + $0x78] sm:$0xff] }
  0x7c   :  { %v69_v63 = vsel %vm58_vm1, %v37_v62, %v59_v61  ;;  %v62_v2 = vsel %vm58_vm1, %v59_v61, %v61_v1  ;;  %v686_v55 = vpack.c.bf16 %v306_v54, %v305_v53  ;;  %685 = vmatprep.subr.bf16.mxu1 %v684_v52  ;;  %v330_v52 = vld [vmem:[%s1117_s3 + $0x138] sm:$0xff] }
  0x7e   :  { %182 = vmatmul.mubr.f32.gmra.mrb[2].mxu0 %v69_v63  ;;  %687 = vmatpush3.bf16.msra.mxu1 %v686_v55 }
  0x7f   :  { %531 = vmatprep.mubr.msk.f32.mxu0 %vm35_vm0, %v64_v0  ;;  %688 = vmatprep.subr.bf16.mxu1 %v752_v4 }
  0x82   :  { %187 = vmatmul.mubr.f32.gmra.mrb[4].mxu0 %v62_v2 }
  0x83   :  { %532 = vmatprep.mubr.msk.f32.mxu0 %vm35_vm0, %v63_v56 }
  0x86   :  { %192 = vmatmul.mubr.f32.gmra.mrb[6].mxu0 %v61_v1 }
 0x14d   :  { %v178_v47 = vpop.f32.mrb[0].mxu0 }
 0x14e   :  { %v179_v48 = vadd.f32 %v528_v42, %v178_v47  ;;  %v180_v49 = vpop.f32.mrb[1].mxu0 }
 0x150   :  { %v197_v57 = vmax.f32 %v179_v48, 0.0  ;;  %v695_v48 = vpack.c.bf16 %v328_v40, %v327_v39 }
 0x151   :  { %v183_v56 = vpop.f32.mrb[2].mxu0 }
 0x152   :  { %v184_v58 = vadd.f32 %v528_v42, %v183_v56  ;;  %v185_v59 = vpop.f32.mrb[3].mxu0  ;;  %v213_v62 = vrot.slane %v197_v57, 2  ;;  %v204_v7 = vrot.slane %v197_v57, 1 }
 0x154   :  { %v1022_v60 = vmax.f32 %v184_v58, 0.0 }
 0x155   :  { %v188_v61 = vpop.f32.mrb[4].mxu0 }
 0x156   :  { %v189_v63 = vadd.f32 %v528_v42, %v188_v61  ;;  %v190_v0 = vpop.f32.mrb[5].mxu0  ;;  %v214_v1 = vrot.slane %v1022_v60, 2  ;;  %v205_v2 = vrot.slane %v1022_v60, 1 }
 0x158   :  { %v199_v3 = vmax.f32 %v189_v63, 0.0  ;;  %v215_v5 = vsel %vm58_vm1, %v213_v62, %v214_v1  ;;  %v206_v13 = vsel %vm203_vm2, %v204_v7, %v205_v2  ;;  %v756_v7 = vmov 0.0  }
 0x159   :  { %v193_v6 = vpop.f32.mrb[6].mxu0  ;;  %216 = vrot.lane.b32.xlu0 %v215_v5, %s753_s25 }
 0x15a   :  { %v230_v8 = vrot.slane %v199_v3, 1  ;;  %v194_v9 = vadd.f32 %v528_v42, %v193_v6  ;;  %v195_v10 = vpop.f32.mrb[7].mxu0  ;;  %v243_v11 = vrot.slane %v199_v3, 2 }
 0x15c   :  { %v1027_v12 = vmax.f32 %v194_v9, 0.0  ;;  %v231_v14 = vsel %vm203_vm2, %v205_v2, %v230_v8 }
 0x15d   :  { %246 = vrot.lane.b32.xlu0 %v243_v11, %s753_s25  ;;  %v717_v15 = vpack.i.bf16 %v231_v14, %v206_v13 }
 0x15e   :  { %v232_v16 = vrot.slane %v1027_v12, 1  ;;  %v244_v19 = vrot.slane %v1027_v12, 2 }
 0x15f   :  { %718 = vrot.lane.b32.xlu1 %v717_v15, %s754_s26 }
 0x160   :  { %v233_v17 = vsel %vm203_vm2, %v230_v8, %v232_v16  ;;  %v245_v20 = vsel %vm58_vm1, %v243_v11, %v244_v19 }
 0x161   :  { %218 = vrot.lane.b32.xlu0 %v214_v1, %s753_s25  ;;  %v722_v18 = vpack.i.bf16 %v205_v2, %v233_v17  ;;  %v698_v1 = vpack.c.bf16 %v330_v52, %v329_v51  ;;  %v331_v2 = vld [vmem:[%s1117_s3 + $0x140] sm:$0xff] }
 0x163   :  { %723 = vrot.lane.b32.xlu1 %v722_v18, %s754_s26 }
 0x165   :  { %250 = vrot.lane.b32.xlu0 %v244_v19, %s753_s25 }
 0x167   :  { %248 = vrot.lane.b32.xlu1 %v245_v20, %s753_s25 }
 0x16b   :  { %238 = vrot.lane.b32.xlu1 %v232_v16, %s754_s26 }
 0x1cb   :  { %v1032_v21 = vpop.permute.xlu0 %216 }
 0x1cf   :  { %v1040_v24 = vpop.permute.xlu0 %246 }
 0x1d0   :  { %v273_v9 = vrot.slane %v1040_v24, 2 }
 0x1d1   :  { %v719_v25 = vpop.permute.xlu1 %718 }
 0x1d2   :  { %v720_v26 = vunpack.i.l.bf16 %v719_v25  ;;  %v721_v27 = vunpack.i.h.bf16 %v719_v25 }
 0x1d3   :  { %v219_v36 = vpop.permute.xlu0 %218 }
 0x1d4   :  { %v226_v29 = vsel %vm225_vm4, %v720_v26, %v1032_v21  ;;  %v223_v30 = vsel %vm222_vm3, %v197_v57, %v720_v26  ;;  %v255_v35 = vsel %vm222_vm3, %v1022_v60, %v721_v27  ;;  %v258_v41 = vsel %vm225_vm4, %v721_v27, %v1040_v24 }
 0x1d5   :  { %v724_v33 = vpop.permute.xlu1 %723  ;;  %412 = vmatprep.mubr.f32.mxu1 %v226_v29  ;;  %v267_v45 = vrot.slane %v255_v35, 2  ;;  %v270_v49 = vrot.slane %v258_v41, 2 }
 0x1d6   :  { %v725_v34 = vunpack.i.l.bf16 %v724_v33  ;;  %413 = vmatmul.mubr.f32.vlgmr.msra.gmra.mrb[0].mxu1 %v223_v30  ;;  %v726_v42 = vunpack.i.h.bf16 %v724_v33 }
 0x1d7   :  { %690 = vmatpush3.bf16.msra.mxu1 %v689_v28  ;;  %v251_v53 = vpop.permute.xlu0 %250 }
 0x1d8   :  { %v256_v38 = vsel %vm222_vm3, %v199_v3, %v725_v34  ;;  %691 = vmatprep.subr.bf16.mxu1 %v752_v4  ;;  %v227_v55 = vsel %vm225_vm4, %v726_v42, %v219_v36  ;;  %v224_v61 = vsel %vm222_vm3, %v1022_v60, %v726_v42  ;;  %v332_v3 = vld [vmem:[%s1117_s3 + $0x148] sm:$0xff] }
 0x1d9   :  { %v268_v43 = vrot.slane %v256_v38, 2  ;;  %v249_v44 = vpop.permute.xlu1 %248  ;;  %v701_v6 = vpack.c.bf16 %v332_v3, %v331_v2 }
 0x1da   :  { %v259_v46 = vsel %vm225_vm4, %v725_v34, %v249_v44  ;;  %v274_v8 = vrot.slane %v249_v44, 2 }
 0x1db   :  { %v271_v47 = vrot.slane %v259_v46, 2  ;;  %693 = vmatpush3.bf16.msra.mxu1 %v692_v37  ;;  %v269_v50 = vsel %vm58_vm1, %v267_v45, %v268_v43 }
 0x1dc   :  { %694 = vmatprep.subr.bf16.mxu1 %v752_v4  ;;  %v288_v0 = vsel %vm287_vm5, %v224_v61, %v269_v50  ;;  %v275_v10 = vsel %vm58_vm1, %v273_v9, %v274_v8 }
 0x1dd   :  { %v239_v54 = vpop.permute.xlu1 %238  ;;  %v272_v56 = vsel %vm58_vm1, %v270_v49, %v271_v47  ;;  %v290_v11 = vsel %vm287_vm5, %v219_v36, %v275_v10 }
 0x1de   :  { %v257_v57 = vsel %vm222_vm3, %v1027_v12, %v239_v54  ;;  %v260_v58 = vsel %vm225_vm4, %v239_v54, %v251_v53  ;;  %v289_v59 = vsel %vm287_vm5, %v227_v55, %v272_v56  ;;  %v280_v12 = vrot.slane %v251_v53, 2 }
 0x1df   :  { %v276_v62 = vrot.slane %v257_v57, 2  ;;  %v278_v63 = vrot.slane %v260_v58, 2  ;;  %696 = vmatpush3.bf16.msra.mxu1 %v695_v48  ;;  %417 = vmatprep.mubr.f32.mxu1 %v289_v59 }
 0x1e0   :  { %418 = vmatmul.mubr.f32.gmra.mrb[2].mxu1 %v288_v0  ;;  %697 = vmatprep.subr.bf16.mxu1 %v752_v4 }
 0x1e1   :  { %v279_v60 = vsel %vm58_vm1, %v271_v47, %v278_v63  ;;  %v277_v5 = vsel %vm58_vm1, %v268_v43, %v276_v62 }
 0x1e2   :  { %422 = vmatprep.mubr.f32.mxu1 %v279_v60 }
 0x1e3   :  { %699 = vmatpush3.bf16.msra.mxu1 %v698_v1 }
 0x1e4   :  { %423 = vmatmul.mubr.f32.gmra.mrb[4].mxu1 %v277_v5  ;;  %700 = vmatprep.subr.bf16.mxu1 %v752_v4  ;;  %v281_v4 = vsel %vm58_vm1, %v274_v8, %v280_v12 }
 0x1e5   :  { %611 = vmatprep.mubr.msk.f32.mxu1 %vm755_vm6, %v756_v7 }
 0x1e7   :  { %702 = vmatpush3.bf16.msra.mxu1 %v701_v6 }
 0x1ea   :  { %612 = vmatmul.mubr.msk.f32.vlgmr.msra.gmra.mrb[6].mxu1 %vm340_vm7, %v1032_v21 }
 0x1eb   :  { %614 = vmatprep.mubr.msk.f32.mxu1 %vm755_vm6, %v756_v7 }
 0x1ee   :  { %615 = vmatmul.mubr.msk.f32.gmra.mrb[8].mxu1 %vm340_vm7, %v290_v11 }
 0x1ef   :  { %617 = vmatprep.mubr.msk.f32.mxu1 %vm755_vm6, %v756_v7 }
 0x1f2   :  { %618 = vmatmul.mubr.msk.f32.gmra.mrb[10].mxu1 %vm340_vm7, %v281_v4 }
 0x2a9   :  { %v569_v13 = vpop.f32.mrb[0].mxu1 }
 0x2aa   :  { %v570_v14 = vpop.f32.mrb[1].mxu1 }
 0x2ab   :  { %v571_v15 = vadd.f32 %v570_v14, %v569_v13 }
 0x2ad   :  { %v415_v23 = vadd.f32 %v571_v15, %v533_v22 }
 0x2b3   :  { %v572_v16 = vpop.f32.mrb[2].mxu1 }
 0x2b4   :  { %v573_v17 = vpop.f32.mrb[3].mxu1 }
 0x2b5   :  { %v574_v18 = vadd.f32 %v573_v17, %v572_v16 }
 0x2b7   :  { %v575_v19 = vpop.f32.mrb[4].mxu1  ;;  %v420_v27 = vadd.f32 %v574_v18, %v533_v22 }
 0x2b8   :  { %v576_v20 = vpop.f32.mrb[5].mxu1 }
 0x2b9   :  { %v577_v21 = vadd.f32 %v576_v20, %v575_v19 }
 0x2bb   :  { %v425_v31 = vadd.f32 %v577_v21, %v533_v22 }
 0x2bd   :  { %v494_v24 = vpop.f32.mrb[6].mxu1 }
 0x2be   :  { %v495_v25 = vadd.f32 %v494_v24, %v415_v23  ;;  %v613_v26 = vpop.f32.mrb[7].mxu1 }
 0x2c0   :  { %509 = vst.msk [vmem:[#allocation2] sm:$0xff] %vm508_vm8, %v495_v25 }
 0x2c1   :  { %v499_v28 = vpop.f32.mrb[8].mxu1 }
 0x2c2   :  { %v500_v29 = vadd.f32 %v499_v28, %v420_v27  ;;  %v616_v30 = vpop.f32.mrb[9].mxu1 }
 0x2c4   :  { %510 = vst.msk [vmem:[#allocation2 + $0x8] sm:$0xff] %vm508_vm8, %v500_v29 }
 0x2c5   :  { %v504_v32 = vpop.f32.mrb[10].mxu1 }
 0x2c6   :  { %v505_v33 = vadd.f32 %v504_v32, %v425_v31  ;;  %v619_v34 = vpop.f32.mrb[11].mxu1 }
 0x2c8   :  { %511 = vst.msk [vmem:[#allocation2 + $0x10] sm:$0xff] %vm508_vm8, %v505_v33 }
 0x2c9   :  { %738 = shalt.err (!%p735_p4)
}
 0x2ca   :  { %s739_s24 = scalar_lea.hbm %s1119_s5, 384 }
 0x2cb   :  { %p740_p5 = scmp.ne.s32.totalorder %s1119_s5, %s739_s24  ;;  %p743_p6 = scmp.lt.u32.totalorder %s739_s24, %s1119_s5 }
 0x2cd   :  { %p745_p7 = pnand %p743_p6, %p740_p5 }
 0x2cf   :  { %748 = shalt.err (!%p745_p7)
}
 0x2d0   :  { %s758_s29 = smov 128   ;;  %s759_s30 = smov 8  }
 0x2d1   :  { %523 = dma.vmem_to_hbm [thread:$0]  %s518_s21, 384, %s1119_s5, [#allocation3], %s758_s29, %s758_s29, %s759_s30  }
 0x2d2   :  { %749 = dma.done.wait [#allocation3], 384  }
 0x2d3   :  { %750 = vsyncadd [#allocation3], 4294966912 }
 0x2d4   :  { %527 = vsyncpa [#allocation3], 1 }

</bundles_post_ra>
